<compile_context>
chip_gen: v6e
topology: v6e:2x2x1
jax: 0.10.0
libtpu: 0.0.40
codegen_flags: <defaults>
</compile_context>

<pallas_src>
import math
from functools import partial

import jax
import jax.numpy as jnp
from jax.experimental import pallas as pl
from jax.experimental.pallas import tpu as pltpu


# ------------------------- fused QKV projection (tiled) -----------------------
def _qkv_matmul_kernel(x_ref, wt_ref, b_ref, o_ref, acc_ref):
    k = pl.program_id(2)

    @pl.when(k == 0)
    def _():
        # Fold the bias add into the accumulator init (one sublane broadcast
        # per (i, j) output tile instead of a full-tile VPU add at the end).
        acc_ref[...] = jnp.broadcast_to(
            b_ref[...].astype(jnp.float32), acc_ref.shape
        )

    acc_ref[...] += jnp.dot(
        x_ref[...], wt_ref[...], preferred_element_type=jnp.float32
    )

    @pl.when(k == pl.num_programs(2) - 1)
    def _():
        o_ref[...] = acc_ref[...].astype(o_ref.dtype)


def _pick_tile(dim, preferred):
    # Largest MXU-friendly tile that evenly divides the dim; otherwise use the
    # full extent (full-extent blocks always satisfy the (8, 128) rule).
    for cand in (preferred, 512, 256, 128):
        if cand <= dim and dim % cand == 0:
            return cand
    return dim


def pallas_qkv_projection(x2d, wqkv_t, bqkv, *, tm=256, tn=256, tk=256):
    """x2d: (M, H); wqkv_t: (H, 3H) pre-transposed; bqkv: (1, 3H) -> (M, 3H)."""
    M, K = x2d.shape
    N = wqkv_t.shape[1]
    tm = _pick_tile(M, tm)
    tn = _pick_tile(N, tn)
    tk = _pick_tile(K, tk)
    grid = (M // tm, N // tn, K // tk)
    return pl.pallas_call(
        _qkv_matmul_kernel,
        out_shape=jax.ShapeDtypeStruct((M, N), x2d.dtype),
        grid_spec=pltpu.PrefetchScalarGridSpec(
            num_scalar_prefetch=0,
            grid=grid,
            in_specs=[
                pl.BlockSpec((tm, tk), lambda i, j, k: (i, k)),
                pl.BlockSpec((tk, tn), lambda i, j, k: (k, j)),
                pl.BlockSpec((1, tn), lambda i, j, k: (0, j)),
            ],
            out_specs=pl.BlockSpec((tm, tn), lambda i, j, k: (i, j)),
            scratch_shapes=[pltpu.VMEM((tm, tn), jnp.float32)],
        ),
        compiler_params=pltpu.CompilerParams(
            dimension_semantics=("parallel", "parallel", "arbitrary")
        ),
    )(x2d, wqkv_t, bqkv)


# ------------------------------ attention core --------------------------------
def _attn_body(qkv, mask, o_ref, *, scale, nH, d, H):
    # qkv: (S, 3H) tile for one batch element, laid out as [Q | K | V] on lanes.
    ctx_heads = []
    for h in range(nH):  # small static head loop; each matmul hits the MXU
        # Fold the 1/sqrt(d) scale into Q: S*d multiplies instead of S*S.
        q = qkv[:, h * d:(h + 1) * d] * scale
        kk = qkv[:, H + h * d:H + (h + 1) * d]
        v = qkv[:, 2 * H + h * d:2 * H + (h + 1) * d]
        s = jnp.dot(q, kk.T, preferred_element_type=jnp.float32)      # (S, S)
        if mask is not None:
            s = s + mask  # additive (1, S) mask broadcasts over query rows
        m = jnp.max(s, axis=-1, keepdims=True)
        p = jnp.exp(s - m)
        l = jnp.sum(p, axis=-1, keepdims=True)
        ctx = jnp.dot(p.astype(qkv.dtype), v, preferred_element_type=jnp.float32)
        # Normalize after PV (S*d multiplies instead of S*S) with the EUP
        # approximate reciprocal (separate VLIW slot from the VALU/exp work).
        ctx_heads.append(ctx * pl.reciprocal(l, approx=True))
    # Single lane-dense (S, H) store for the whole block.
    o_ref[...] = jnp.concatenate(ctx_heads, axis=-1).astype(o_ref.dtype)


def _attn_kernel_nomask(qkv_ref, o_ref, *, scale, nH, d, H):
    _attn_body(qkv_ref[...], None, o_ref, scale=scale, nH=nH, d=d, H=H)


def _attn_kernel_masked(qkv_ref, mask_ref, o_ref, *, scale, nH, d, H):
    _attn_body(qkv_ref[...], mask_ref[...], o_ref, scale=scale, nH=nH, d=d, H=H)


def pallas_attention(qkv, num_attention_heads, head_dim, attention_mask=None):
    """qkv: (B, S, 3H) packed QKV -> context (B, S, H). No head transposes."""
    B, S, H3 = qkv.shape
    H = H3 // 3
    nH, d = num_attention_heads, head_dim
    scale = 1.0 / math.sqrt(d)

    # None in block_shape squeezes the batch dim out of the kernel view.
    qkv_spec = pl.BlockSpec((None, S, 3 * H), lambda b: (b, 0, 0))
    out_spec = pl.BlockSpec((None, S, H), lambda b: (b, 0, 0))

    if attention_mask is None:
        kernel = partial(_attn_kernel_nomask, scale=scale, nH=nH, d=d, H=H)
        in_specs = [qkv_spec]
        args = (qkv,)
    else:
        # Accept (B, S), (B, 1, S) or (B, 1, 1, S) additive masks (BERT style).
        mask = attention_mask.reshape(B, 1, S).astype(jnp.float32)
        mask_spec = pl.BlockSpec((None, 1, S), lambda b: (b, 0, 0))
        kernel = partial(_attn_kernel_masked, scale=scale, nH=nH, d=d, H=H)
        in_specs = [qkv_spec, mask_spec]
        args = (qkv, mask)

    return pl.pallas_call(
        kernel,
        out_shape=jax.ShapeDtypeStruct((B, S, H), qkv.dtype),
        grid=(B,),
        in_specs=in_specs,
        out_specs=out_spec,
        compiler_params=pltpu.CompilerParams(dimension_semantics=("parallel",)),
    )(*args)


# ------------------------------- module wrapper --------------------------------
def prepare_params(params):
    """One-time parameter prep (do NOT repeat per forward): stack the
    torch-layout (O, H) Q/K/V weights into a single (H, 3H) right-hand side so
    the hot matmul is x @ W^T with no per-step transpose, and stack the biases
    into (1, 3H)."""
    wqkv_t = jnp.concatenate(
        [params["wq"].T, params["wk"].T, params["wv"].T], axis=1
    )
    bqkv = jnp.concatenate([params["bq"], params["bk"], params["bv"]])[None, :]
    return wqkv_t, bqkv


def bert_self_attention(hidden_states, wqkv_t, bqkv, num_attention_heads,
                        attention_mask=None):
    """hidden_states: (B, S, H). Returns context_layer (B, S, H)."""
    B, S, H = hidden_states.shape
    d = H // num_attention_heads
    x2d = hidden_states.reshape(B * S, H)           # free reshape, no transpose
    qkv = pallas_qkv_projection(x2d, wqkv_t, bqkv)  # (B*S, 3H)
    qkv = qkv.reshape(B, S, 3 * H)                  # free reshape, no transpose
    return pallas_attention(qkv, num_attention_heads, d, attention_mask)


# ----------------------------------- main ---------------------------------------
if __name__ == "__main__":
    B, S, H, nH = 2, 8, 32, 4
    d = H // nH

    key = jax.random.PRNGKey(0)
    ks = jax.random.split(key, 7)
    bound = 1.0 / math.sqrt(H)
    params = {
        "wq": jax.random.uniform(ks[0], (H, H), jnp.float32, -bound, bound),
        "bq": jax.random.uniform(ks[1], (H,), jnp.float32, -bound, bound),
        "wk": jax.random.uniform(ks[2], (H, H), jnp.float32, -bound, bound),
        "bk": jax.random.uniform(ks[3], (H,), jnp.float32, -bound, bound),
        "wv": jax.random.uniform(ks[4], (H, H), jnp.float32, -bound, bound),
        "bv": jax.random.uniform(ks[5], (H,), jnp.float32, -bound, bound),
    }
    hidden_states = jax.random.normal(ks[6], (B, S, H), jnp.float32)

    wqkv_t, bqkv = prepare_params(params)

    # Pure-JAX reference (matches torch BertSelfAttention, eval mode).
    def ref(x, add_mask=None):
        q = (x.reshape(B * S, H) @ params["wq"].T + params["bq"]).reshape(
            B, S, nH, d).transpose(0, 2, 1, 3)
        k = (x.reshape(B * S, H) @ params["wk"].T + params["bk"]).reshape(
            B, S, nH, d).transpose(0, 2, 1, 3)
        v = (x.reshape(B * S, H) @ params["wv"].T + params["bv"]).reshape(
            B, S, nH, d).transpose(0, 2, 1, 3)
        s = jnp.einsum("bhqd,bhkd->bhqk", q, k) / math.sqrt(d)
        if add_mask is not None:
            s = s + add_mask[:, None, None, :]
        p = jax.nn.softmax(s, axis=-1)
        c = jnp.einsum("bhqk,bhkd->bhqd", p, v)
        return c.transpose(0, 2, 1, 3).reshape(B, S, H)

    # Unmasked path.
    out = bert_self_attention(hidden_states, wqkv_t, bqkv, nH)
    out = jax.block_until_ready(out)
    assert jnp.allclose(out, ref(hidden_states), atol=2e-3, rtol=2e-3)

    # Masked path (BERT-style additive padding mask: 0 keep, -10000 masked).
    valid_len = jnp.array([S, 5])
    keep = (jnp.arange(S)[None, :] < valid_len[:, None]).astype(jnp.float32)
    add_mask = (1.0 - keep) * -10000.0                     # (B, S)
    out_m = bert_self_attention(hidden_states, wqkv_t, bqkv, nH,
                                attention_mask=add_mask)
    out_m = jax.block_until_ready(out_m)
    assert jnp.allclose(out_m, ref(hidden_states, add_mask), atol=2e-3, rtol=2e-3)

    print("KERNEL_OK")
</pallas_src>

<mosaic_0001>
module attributes {stable_mosaic.version = 11 : i64} {
  func.func @_qkv_matmul_kernel(%arg0: i32, %arg1: i32, %arg2: i32, %arg3: memref<16x32xf32, #tpu.memory_space<vmem>>, %arg4: memref<32x96xf32, #tpu.memory_space<vmem>>, %arg5: memref<1x96xf32, #tpu.memory_space<vmem>>, %arg6: memref<16x96xf32, #tpu.memory_space<vmem>>, %arg7: memref<16x96xf32, #tpu.memory_space<vmem>>) attributes {dimension_semantics = [#tpu.dimension_semantics<parallel>, #tpu.dimension_semantics<parallel>, #tpu.dimension_semantics<arbitrary>], iteration_bounds = array<i64: 1, 1, 1>, scalar_prefetch = 0 : i64, scratch_operands = 1 : i64, tpu.core_type = #tpu.core_type<tc>, window_params = [{transform_indices = @transform_0, window_bounds = array<i64: 16, 32>}, {transform_indices = @transform_1, window_bounds = array<i64: 32, 96>}, {transform_indices = @transform_2, window_bounds = array<i64: 1, 96>}, {transform_indices = @transform_3, window_bounds = array<i64: 16, 96>}]} {
    %c0_i32 = arith.constant 0 : i32
    %0 = arith.cmpi eq, %arg2, %c0_i32 : i32
    %1 = arith.extui %0 : i1 to i32
    %c0_i32_0 = arith.constant 0 : i32
    %2 = arith.cmpi ne, %1, %c0_i32_0 : i32
    scf.if %2 {
      %c0_10 = arith.constant 0 : index
      %c0_11 = arith.constant 0 : index
      %12 = vector.load %arg5[%c0_10, %c0_11] : memref<1x96xf32, #tpu.memory_space<vmem>>, vector<1x96xf32>
      %13 = vector.shape_cast %12 : vector<1x96xf32> to vector<1x96xf32>
      %14 = vector.broadcast %13 : vector<1x96xf32> to vector<16x96xf32>
      %c0_12 = arith.constant 0 : index
      %c0_13 = arith.constant 0 : index
      %15 = vector.load %arg7[%c0_12, %c0_13] : memref<16x96xf32, #tpu.memory_space<vmem>>, vector<16x96xf32>
      tpu.vector_store %arg7[%c0_12, %c0_13], %14 {strides = array<i32>} : memref<16x96xf32, #tpu.memory_space<vmem>>, vector<16x96xf32>,
    } else {
    }
    %c0 = arith.constant 0 : index
    %c0_1 = arith.constant 0 : index
    %3 = vector.load %arg7[%c0, %c0_1] : memref<16x96xf32, #tpu.memory_space<vmem>>, vector<16x96xf32>
    %c0_2 = arith.constant 0 : index
    %c0_3 = arith.constant 0 : index
    %4 = vector.load %arg3[%c0_2, %c0_3] : memref<16x32xf32, #tpu.memory_space<vmem>>, vector<16x32xf32>
    %c0_4 = arith.constant 0 : index
    %c0_5 = arith.constant 0 : index
    %5 = vector.load %arg4[%c0_4, %c0_5] : memref<32x96xf32, #tpu.memory_space<vmem>>, vector<32x96xf32>
    %cst = arith.constant dense<0.000000e+00> : vector<16x96xf32>
    %6 = tpu.matmul %4, %5, %cst {dimension_numbers = #tpu.dot_dimension_numbers<[1], [0], [0], [1], [0, 0, 1, 1], [], []>} : vector<16x32xf32>, vector<32x96xf32>, vector<16x96xf32> -> vector<16x96xf32>
    %7 = arith.addf %3, %6 : vector<16x96xf32>
    %c0_6 = arith.constant 0 : index
    %c0_7 = arith.constant 0 : index
    %8 = vector.load %arg7[%c0_6, %c0_7] : memref<16x96xf32, #tpu.memory_space<vmem>>, vector<16x96xf32>
    tpu.vector_store %arg7[%c0_6, %c0_7], %7 {strides = array<i32>} : memref<16x96xf32, #tpu.memory_space<vmem>>, vector<16x96xf32>,
    %c0_i32_8 = arith.constant 0 : i32
    %9 = arith.cmpi eq, %arg2, %c0_i32_8 : i32
    %10 = arith.extui %9 : i1 to i32
    %c0_i32_9 = arith.constant 0 : i32
    %11 = arith.cmpi ne, %10, %c0_i32_9 : i32
    scf.if %11 {
      %c0_10 = arith.constant 0 : index
      %c0_11 = arith.constant 0 : index
      %12 = vector.load %arg7[%c0_10, %c0_11] : memref<16x96xf32, #tpu.memory_space<vmem>>, vector<16x96xf32>
      %c0_12 = arith.constant 0 : index
      %c0_13 = arith.constant 0 : index
      %13 = vector.load %arg6[%c0_12, %c0_13] : memref<16x96xf32, #tpu.memory_space<vmem>>, vector<16x96xf32>
      tpu.vector_store %arg6[%c0_12, %c0_13], %12 {strides = array<i32>} : memref<16x96xf32, #tpu.memory_space<vmem>>, vector<16x96xf32>,
    } else {
    }
    return
  }
  func.func @transform_0(%arg0: i32, %arg1: i32, %arg2: i32) -> (i32, i32) {
    %c0_i32 = arith.constant 0 : i32
    return %arg0, %arg2 : i32, i32
  }
  func.func @transform_1(%arg0: i32, %arg1: i32, %arg2: i32) -> (i32, i32) {
    %c0_i32 = arith.constant 0 : i32
    return %arg2, %arg1 : i32, i32
  }
  func.func @transform_2(%arg0: i32, %arg1: i32, %arg2: i32) -> (i32, i32) {
    %c0_i32 = arith.constant 0 : i32
    %c0_i32_0 = arith.constant 0 : i32
    return %c0_i32, %arg1 : i32, i32
  }
  func.func @transform_3(%arg0: i32, %arg1: i32, %arg2: i32) -> (i32, i32) {
    %c0_i32 = arith.constant 0 : i32
    return %arg0, %arg1 : i32, i32
  }
}

</mosaic_0001>

<bundles_post_ra>
// kernel: tpu_custom_call.1
= control target key start
LH: loop header
LB: loop body
LE: loop exit
PB: predicated region body
PF: predicated region fallthrough
CT: control target
= control target key end

     0   :  { %8 = vsyncpa [#allocation4], 0  ;;  %s322_s0 = inlined_call_operand.hbm [shape: f32[16,32], index: 0, kind: input, shape index: {}]   ;;  %s323_s1 = inlined_call_operand.hbm [shape: f32[32,96], index: 1, kind: input, shape index: {}]   ;;  %s324_s2 = inlined_call_operand.vmem [shape: f32[1,96], index: 2, kind: input, shape index: {}]   ;;  %s325_s3 = inlined_call_operand.hbm [shape: f32[16,96], index: 3, kind: output, shape index: {}]  }
   0x1   :  { %9 = vsyncpa [#allocation7], 0 }
   0x2   :  { %10 = vsyncpa [#allocation5], 0  ;;  %s268_s12 = smov [#allocation3]  }
   0x3   :  { %s16_s13 = sshll.u32 %s268_s12, 4  ;;  %s17_s13 = int_to_ptr.vmem [resolvable:$true] %s16_s13 }
   0x4   :  { %s210_s14 = scalar_lea.vmem %s17_s13, 256  ;;  %p215_p1 = scmp.lt.s32.totalorder %s17_s13, %s17_s13 }
   0x5   :  { %p211_p0 = scmp.ne.s32.totalorder %s17_s13, %s210_s14  ;;  %p216_p2 = scmp.lt.s32.totalorder %s210_s14, %s210_s14 }
   0x7   :  { %p217_p3 = por %p216_p2, %p215_p1 }
   0x9   :  { %p218_p4 = pnand %p217_p3, %p211_p0 }
   0xb   :  { %221 = shalt.err (!%p218_p4)
}
   0xc   :  { %s269_s15 = smov 128   ;;  %s270_s16 = smov 8  }
   0xd   :  { %22 = dma.hbm_to_vmem [thread:$0]  %s322_s0, 256, %s17_s13, [#allocation4], %s269_s15, %s269_s15, %s270_s16  }
   0xe   :  { %s271_s19 = smov [#allocation6]  }
   0xf   :  { %s28_s20 = sshll.u32 %s271_s19, 4  ;;  %s29_s20 = int_to_ptr.vmem [resolvable:$true] %s28_s20 }
  0x10   :  { %s230_s21 = scalar_lea.vmem %s29_s20, 512  ;;  %p235_p6 = scmp.lt.s32.totalorder %s29_s20, %s29_s20 }
  0x11   :  { %p231_p5 = scmp.ne.s32.totalorder %s29_s20, %s230_s21  ;;  %p236_p7 = scmp.lt.s32.totalorder %s230_s21, %s230_s21 }
  0x13   :  { %p237_p8 = por %p236_p7, %p235_p6 }
  0x15   :  { %p238_p9 = pnand %p237_p8, %p231_p5 }
  0x17   :  { %241 = shalt.err (!%p238_p9)
}
  0x18   :  { %34 = dma.hbm_to_vmem [thread:$0]  %s323_s1, 512, %s29_s20, [#allocation7], %s269_s15, %s269_s15, %s270_s16  }
  0x19   :  { %262 = dma.done.wait [#allocation4], 256  }
  0x1a   :  { %263 = vsyncadd [#allocation4], 4294967040 }
  0x1b   :  { %264 = dma.done.wait [#allocation7], 512  }
  0x1c   :  { %265 = vsyncadd [#allocation7], 4294966784  ;;  %vm65_vm0 = vcmask 261120   ;;  %v64_v0 = vld [vmem:[#allocation6 + $0x18] sm:$0xff]  ;;  %v63_v1 = vld [vmem:[#allocation6 + $0x10] sm:$0xff]  ;;  %vm54_vm1 = vcmask 785408  }
  0x1d   :  { %186 = vmatprep.subr.mxu0 %v64_v0  ;;  %v59_v2 = vld [vmem:[#allocation3] sm:$0xff]  ;;  %v62_v3 = vld [vmem:[#allocation6 + $0x8] sm:$0xff]  ;;  %v177_v4 = vld [vmem:[%s324_s2] ss:$0 sm:$0xff]  ;;  %s272_s1 = smov [#allocation8]  }
  0x1e   :  { %187 = vmatpush3.msra.mxu0 %v64_v0  ;;  %194 = vmatprep.mubr.msk.f32.mxu0 %vm65_vm0, %v59_v2  ;;  %56 = vst.msk [vmem:[#allocation2 + $0x8] sm:$0xff] %vm54_vm1, %v177_v4  ;;  %55 = vst.msk [vmem:[#allocation2] sm:$0xff] %vm54_vm1, %v177_v4  ;;  %v61_v5 = vld [vmem:[#allocation6] sm:$0xff]  ;;  %v60_v6 = vld [vmem:[#allocation3 + $0x8] sm:$0xff]  ;;  %s164_s2 = sshll.u32 %s272_s1, 4  ;;  %s165_s2 = int_to_ptr.vmem [resolvable:$true] %s164_s2 }
  0x1f   :  { %188 = vmatprep.subr.mxu0 %v63_v1  ;;  %s242_s25 = scalar_lea.vmem %s165_s2, 256  ;;  %p247_p11 = scmp.lt.s32.totalorder %s165_s2, %s165_s2 }
  0x20   :  { %189 = vmatpush3.msra.mxu0 %v63_v1  ;;  %p243_p10 = scmp.ne.s32.totalorder %s165_s2, %s242_s25  ;;  %p248_p12 = scmp.lt.s32.totalorder %s242_s25, %s242_s25 }
  0x21   :  { %190 = vmatprep.subr.mxu0 %v62_v3 }
  0x22   :  { %191 = vmatpush3.msra.mxu0 %v62_v3  ;;  %p249_p13 = por %p248_p12, %p247_p11 }
  0x23   :  { %192 = vmatprep.subr.mxu0 %v61_v5 }
  0x24   :  { %193 = vmatpush3.msra.mxu0 %v61_v5  ;;  %p250_p0 = pnand %p249_p13, %p243_p10 }
  0x25   :  { %195 = vmatmul.mubr.msk.f32.vlgmr.msra.gmra.mxu0 %vm65_vm0, %v60_v6  ;;  %v58_v7 = vld [vmem:[#allocation2 + $0x8] sm:$0xff]  ;;  %v57_v9 = vld [vmem:[#allocation2] sm:$0xff] }
  0xe5   :  { %v196_v8 = vpop.f32.mrf.mxu0 }
  0xe6   :  { %v148_v10 = vadd.f32 %v196_v8, %v58_v7 }
  0xe7   :  { %v138_v11 = vpop.f32.mrf.mxu0 }
  0xe8   :  { %151 = vst.msk [vmem:[#allocation2 + $0x8] sm:$0xff] %vm54_vm1, %v148_v10  ;;  %v147_v12 = vadd.f32 %v138_v11, %v57_v9 }
  0xea   :  { %150 = vst.msk [vmem:[#allocation2] sm:$0xff] %vm54_vm1, %v147_v12 }
  0xef   :  { %v156_v13 = vld [vmem:[#allocation2 + $0x8] sm:$0xff] }
  0xf0   :  { %158 = vst.msk [vmem:[#allocation8 + $0x8] sm:$0xff] %vm54_vm1, %v156_v13 }
  0xf1   :  { %v155_v14 = vld [vmem:[#allocation2] sm:$0xff] }
  0xf2   :  { %157 = vst.msk [vmem:[#allocation8] sm:$0xff] %vm54_vm1, %v155_v14 }
  0xf3   :  { %253 = shalt.err (!%p250_p0)
}
  0xf4   :  { %170 = dma.vmem_to_hbm [thread:$0]  %s165_s2, 256, %s325_s3, [#allocation5], %s269_s15, %s269_s15, %s270_s16  }
  0xf5   :  { %266 = dma.done.wait [#allocation5], 256  }
  0xf6   :  { %267 = vsyncadd [#allocation5], 4294967040 }
  0xf7   :  { %174 = vsyncpa [#allocation4], 1 }
  0xf8   :  { %175 = vsyncpa [#allocation7], 1 }
  0xf9   :  { %176 = vsyncpa [#allocation5], 1 }

</bundles_post_ra>
